<compile_context>
chip_gen: v7x
topology: tpu7x:2x2x1
jax: 0.10.0
libtpu: 0.0.40
codegen_flags: <defaults>
</compile_context>

<pallas_src>
import functools

import jax
import jax.numpy as jnp
from jax.experimental import pallas as pl
from jax.experimental.pallas import tpu as pltpu


def _cbam_kernel(convw_ref, shift_ref, x_ref, w1t_ref, b1_ref, w2t_ref,
                 b2_ref, o_ref, *, W):
    # x_ref block: (NB, C, HW), lane axis = HW (lane-dense).
    xb = x_ref[...].astype(jnp.float32)
    NB, C, HW = xb.shape

    # ---------------- Channel gate ----------------
    avg = jnp.mean(xb, axis=-1)                          # (NB, C)
    mx = jnp.max(xb, axis=-1)                            # (NB, C)
    # Stack avg & max along sublanes -> single MLP pass (2 MXU dots, not 4).
    pooled = jnp.concatenate([avg, mx], axis=0)          # (2*NB, C)
    h = jnp.dot(pooled, w1t_ref[...],
                preferred_element_type=jnp.float32) + b1_ref[...]
    h = jnp.maximum(h, 0.0)
    att2 = jnp.dot(h, w2t_ref[...],
                   preferred_element_type=jnp.float32) + b2_ref[...]
    att = att2[:NB, :] + att2[NB:, :]                    # mlp(avg) + mlp(max)
    ch_scale = jax.nn.sigmoid(att)                       # (NB, C)
    x_ch = xb * ch_scale[:, :, None]                     # (NB, C, HW)

    # ---------------- Spatial gate ----------------
    # ChannelPool: max / mean over the channel (sublane) axis, then stack the
    # two maps along sublanes so each 7-tap offset needs ONE roll, not two.
    mx_c = jnp.max(x_ch, axis=1)                         # (NB, HW)
    mean_c = jnp.mean(x_ch, axis=1)                      # (NB, HW)
    comp = jnp.concatenate([mx_c, mean_c], axis=0)       # (2*NB, HW)

    row = jax.lax.broadcasted_iota(jnp.int32, (2 * NB, HW), 0)
    col = jax.lax.broadcasted_iota(jnp.int32, (2 * NB, HW), 1) % W
    is_max_row = row < NB

    acc2 = jnp.zeros((2 * NB, HW), jnp.float32)
    for k in range(7):                                   # static unroll, 7 taps
        d = k - 3                                        # offset along W
        if d == 0:
            r = comp
        else:
            # result[j] = comp[j + d] (mod HW); axis must be non-negative.
            r = pltpu.roll(comp, shift=(-d) % HW, axis=1)
        wk = jnp.where(is_max_row, convw_ref[0, k], convw_ref[1, k])
        tap = wk * r
        if d > 0:
            tap = jnp.where(col < W - d, tap, 0.0)       # don't cross W rows
        elif d < 0:
            tap = jnp.where(col >= -d, tap, 0.0)
        acc2 = acc2 + tap

    acc = acc2[:NB, :] + acc2[NB:, :] + shift_ref[0]     # folded BN shift
    sp_scale = jax.nn.sigmoid(acc)                       # (NB, HW)
    o_ref[...] = (x_ch * sp_scale[:, None, :]).astype(o_ref.dtype)


def cbam_forward(x, params):
    """Pallas CBAM forward. x: (N, C, H, W) or (N, 4, W) (unsqueezed like torch)."""
    if x.ndim == 3 and x.shape[1] == 4:
        x = x[:, :, None, :]
    if not jnp.issubdtype(x.dtype, jnp.floating):
        x = x.astype(jnp.float32)
    N, C, H, W = x.shape
    HW = H * W
    xf = x.reshape(N, C, HW)                             # lane-dense layout

    w1 = params["w1"]                                    # (hidden, C)
    b1 = params["b1"]                                    # (hidden, 1)
    w2 = params["w2"]                                    # (C, hidden)
    b2 = params["b2"]                                    # (C, 1)
    hidden = w1.shape[0]
    w1t = jnp.transpose(w1).astype(jnp.float32)          # (C, hidden)
    b1r = b1.reshape(1, hidden).astype(jnp.float32)      # (1, hidden)
    w2t = jnp.transpose(w2).astype(jnp.float32)          # (hidden, C)
    b2r = b2.reshape(1, C).astype(jnp.float32)           # (1, C)

    # Fold eval-mode BatchNorm2d(1) into the (bias-free) conv.
    eps = 1e-5
    s = (params["bn_gamma"] / jnp.sqrt(params["bn_var"] + eps)).reshape(())
    conv_w_folded = (params["conv_w"].reshape(2, 7) * s).astype(jnp.float32)
    shift = (params["bn_beta"] - params["bn_mean"] * s).reshape(1).astype(
        jnp.float32)

    # ---- Block sizing (per-generation VMEM aware) ----
    try:
        vmem_phys = int(pltpu.get_tpu_info().vmem_capacity_bytes)
    except Exception:
        vmem_phys = 64 * 1024 * 1024                     # conservative: v7x per-TC
    scoped = int(min(vmem_phys // 2, 32 * 1024 * 1024))  # headroom vs physical

    itemsize = x.dtype.itemsize
    per_n_io = C * HW * itemsize                         # one batch element, I/O dtype
    per_n_f32 = C * HW * 4
    # 2x in + 2x out pipeline buffers + ~3 block-sized f32 temporaries
    # (xb-f32, x_ch, output value) materialized by full-block jnp ops.
    per_n_foot = 4 * per_n_io + 3 * per_n_f32
    nb_cap = max(1, scoped // per_n_foot)
    # Keep the input block in the measured 0.5-2 MiB sweet spot.
    nb_cap = min(nb_cap, max(1, (2 * 1024 * 1024) // per_n_io))
    # Grid must be >= 2 so both v7x TensorCores get work (free on v5e/v6e).
    nb = min(nb_cap, max(1, -(-N // 2)), N)
    # Prefer an exact divisor of N (avoids padding copies / a remainder call).
    best_div = 1
    for d in range(1, nb + 1):
        if N % d == 0:
            best_div = d
    if 2 * best_div >= nb:
        nb = best_div

    kernel = functools.partial(_cbam_kernel, W=W)

    def _call(x_chunk, nb_chunk):
        n_chunk = x_chunk.shape[0]
        return pl.pallas_call(
            kernel,
            out_shape=jax.ShapeDtypeStruct((n_chunk, C, HW), x.dtype),
            grid=(n_chunk // nb_chunk,),
            in_specs=[
                pl.BlockSpec(memory_space=pltpu.MemorySpace.SMEM),  # conv (2,7)
                pl.BlockSpec(memory_space=pltpu.MemorySpace.SMEM),  # shift (1,)
                pl.BlockSpec((nb_chunk, C, HW), lambda n: (n, 0, 0)),
                pl.BlockSpec((C, hidden), lambda n: (0, 0)),        # w1^T
                pl.BlockSpec((1, hidden), lambda n: (0, 0)),        # b1
                pl.BlockSpec((hidden, C), lambda n: (0, 0)),        # w2^T
                pl.BlockSpec((1, C), lambda n: (0, 0)),             # b2
            ],
            out_specs=pl.BlockSpec((nb_chunk, C, HW), lambda n: (n, 0, 0)),
            compiler_params=pltpu.CompilerParams(
                dimension_semantics=("parallel",),
                vmem_limit_bytes=scoped),
            cost_estimate=pl.CostEstimate(
                flops=int(8 * n_chunk * C * HW),
                transcendentals=int(n_chunk * (C + HW)),
                bytes_accessed=int(2 * n_chunk * C * HW * itemsize)),
        )(conv_w_folded, shift, x_chunk, w1t, b1r, w2t, b2r)

    n_main = (N // nb) * nb
    pieces = []
    if n_main:
        pieces.append(_call(xf[:n_main], nb))
    if N - n_main:
        pieces.append(_call(xf[n_main:], N - n_main))
    out = pieces[0] if len(pieces) == 1 else jnp.concatenate(pieces, axis=0)
    return out.reshape(N, C, H, W)


def cbam_reference(x, params):
    """Plain-JAX reference (mirrors the PyTorch forward, eval-mode BN)."""
    if x.ndim == 3 and x.shape[1] == 4:
        x = x[:, :, None, :]
    x = x.astype(jnp.float32)
    w1, b1 = params["w1"], params["b1"].reshape(-1)
    w2, b2 = params["w2"], params["b2"].reshape(-1)

    avg = x.mean(axis=(2, 3))           # (N, C)
    mx = x.max(axis=(2, 3))             # (N, C)

    def mlp(v):
        h = jax.nn.relu(v @ w1.T + b1)
        return h @ w2.T + b2

    att = mlp(avg) + mlp(mx)
    ch_scale = jax.nn.sigmoid(att)[:, :, None, None]
    xc = x * ch_scale

    comp = jnp.concatenate(
        [xc.max(axis=1, keepdims=True), xc.mean(axis=1, keepdims=True)], axis=1)
    conv = jax.lax.conv_general_dilated(
        comp, params["conv_w"], window_strides=(1, 1),
        padding=((0, 0), (3, 3)),
        dimension_numbers=("NCHW", "OIHW", "NCHW"))
    bn = ((conv - params["bn_mean"]) / jnp.sqrt(params["bn_var"] + 1e-5)
          * params["bn_gamma"] + params["bn_beta"])
    return xc * jax.nn.sigmoid(bn)


def make_params(key, gate_channels, reduction_ratio=16):
    hidden = gate_channels // reduction_ratio
    k1, k2, k3, k4, k5 = jax.random.split(key, 5)
    return {
        "w1": 0.1 * jax.random.normal(k1, (hidden, gate_channels), jnp.float32),
        "b1": 0.1 * jax.random.normal(k2, (hidden, 1), jnp.float32),
        "w2": 0.1 * jax.random.normal(k3, (gate_channels, hidden), jnp.float32),
        "b2": 0.1 * jax.random.normal(k4, (gate_channels, 1), jnp.float32),
        "conv_w": 0.1 * jax.random.normal(k5, (1, 2, 1, 7), jnp.float32),
        "bn_gamma": jnp.ones((1,), jnp.float32),
        "bn_beta": jnp.zeros((1,), jnp.float32),
        "bn_mean": jnp.zeros((1,), jnp.float32),
        "bn_var": jnp.ones((1,), jnp.float32),
    }


if __name__ == "__main__":
    N, C, H, W = 2, 32, 8, 16          # gate_channels=32, reduction_ratio=16
    key = jax.random.PRNGKey(0)
    kp, kx = jax.random.split(key)
    params = make_params(kp, gate_channels=C, reduction_ratio=16)
    x = jax.random.normal(kx, (N, C, H, W), jnp.float32)

    out = jax.block_until_ready(cbam_forward(x, params))
    ref = jax.block_until_ready(cbam_reference(x, params))

    assert out.shape == (N, C, H, W), out.shape
    assert jnp.allclose(out, ref, rtol=1e-4, atol=1e-4), (
        float(jnp.max(jnp.abs(out - ref))))
    print("KERNEL_OK")
</pallas_src>

<mosaic_0001>
module attributes {stable_mosaic.version = 11 : i64} {
  func.func @_cbam_kernel(%arg0: i32, %arg1: memref<2x7xf32, #tpu.memory_space<smem>>, %arg2: memref<1xf32, #tpu.memory_space<smem>>, %arg3: memref<1x32x128xf32, #tpu.memory_space<vmem>>, %arg4: memref<32x2xf32, #tpu.memory_space<vmem>>, %arg5: memref<1x2xf32, #tpu.memory_space<vmem>>, %arg6: memref<2x32xf32, #tpu.memory_space<vmem>>, %arg7: memref<1x32xf32, #tpu.memory_space<vmem>>, %arg8: memref<1x32x128xf32, #tpu.memory_space<vmem>>) attributes {dimension_semantics = [#tpu.dimension_semantics<parallel>], iteration_bounds = array<i64: 2>, scalar_prefetch = 0 : i64, scratch_operands = 0 : i64, tpu.core_type = #tpu.core_type<tc>, window_params = [{transform_indices = @transform_0, window_bounds = array<i64: 2, 7>}, {transform_indices = @transform_1, window_bounds = array<i64: 1>}, {transform_indices = @transform_2, window_bounds = array<i64: 1, 32, 128>}, {pipeline_mode = #tpu.pipeline_mode<synchronous>, transform_indices = @transform_3, window_bounds = array<i64: 32, 2>}, {pipeline_mode = #tpu.pipeline_mode<synchronous>, transform_indices = @transform_4, window_bounds = array<i64: 1, 2>}, {pipeline_mode = #tpu.pipeline_mode<synchronous>, transform_indices = @transform_5, window_bounds = array<i64: 2, 32>}, {pipeline_mode = #tpu.pipeline_mode<synchronous>, transform_indices = @transform_6, window_bounds = array<i64: 1, 32>}, {transform_indices = @transform_7, window_bounds = array<i64: 1, 32, 128>}]} {
    %c0 = arith.constant 0 : index
    %c0_0 = arith.constant 0 : index
    %c0_1 = arith.constant 0 : index
    %0 = vector.load %arg3[%c0, %c0_0, %c0_1] : memref<1x32x128xf32, #tpu.memory_space<vmem>>, vector<1x32x128xf32>
    %cst = arith.constant dense<0.000000e+00> : vector<1x32xf32>
    %1 = vector.multi_reduction <add>, %0, %cst [2] : vector<1x32x128xf32> to vector<1x32xf32>
    %cst_2 = arith.constant 1.280000e+02 : f32
    %2 = vector.broadcast %cst_2 : f32 to vector<1x32xf32>
    %3 = arith.divf %1, %2 : vector<1x32xf32>
    %cst_3 = arith.constant dense<0xFF800000> : vector<1x32xf32>
    %4 = vector.multi_reduction <maximumf>, %0, %cst_3 [2] : vector<1x32x128xf32> to vector<1x32xf32>
    %5 = tpu.concatenate %3, %4 in 0 : vector<1x32xf32>, vector<1x32xf32> -> vector<2x32xf32>
    %c0_4 = arith.constant 0 : index
    %c0_5 = arith.constant 0 : index
    %6 = vector.load %arg4[%c0_4, %c0_5] : memref<32x2xf32, #tpu.memory_space<vmem>>, vector<32x2xf32>
    %cst_6 = arith.constant dense<0.000000e+00> : vector<2x2xf32>
    %7 = tpu.matmul %5, %6, %cst_6 {dimension_numbers = #tpu.dot_dimension_numbers<[1], [0], [0], [1], [0, 0, 1, 1], [], []>} : vector<2x32xf32>, vector<32x2xf32>, vector<2x2xf32> -> vector<2x2xf32>
    %c0_7 = arith.constant 0 : index
    %c0_8 = arith.constant 0 : index
    %8 = vector.load %arg5[%c0_7, %c0_8] : memref<1x2xf32, #tpu.memory_space<vmem>>, vector<1x2xf32>
    %9 = vector.broadcast %8 : vector<1x2xf32> to vector<2x2xf32>
    %10 = arith.addf %7, %9 : vector<2x2xf32>
    %cst_9 = arith.constant 0.000000e+00 : f32
    %11 = vector.broadcast %cst_9 : f32 to vector<2x2xf32>
    %12 = arith.maximumf %10, %11 : vector<2x2xf32>
    %c0_10 = arith.constant 0 : index
    %c0_11 = arith.constant 0 : index
    %13 = vector.load %arg6[%c0_10, %c0_11] : memref<2x32xf32, #tpu.memory_space<vmem>>, vector<2x32xf32>
    %cst_12 = arith.constant dense<0.000000e+00> : vector<2x32xf32>
    %14 = tpu.matmul %12, %13, %cst_12 {dimension_numbers = #tpu.dot_dimension_numbers<[1], [0], [0], [1], [0, 0, 1, 1], [], []>} : vector<2x2xf32>, vector<2x32xf32>, vector<2x32xf32> -> vector<2x32xf32>
    %c0_13 = arith.constant 0 : index
    %c0_14 = arith.constant 0 : index
    %15 = vector.load %arg7[%c0_13, %c0_14] : memref<1x32xf32, #tpu.memory_space<vmem>>, vector<1x32xf32>
    %16 = vector.broadcast %15 : vector<1x32xf32> to vector<2x32xf32>
    %17 = arith.addf %14, %16 : vector<2x32xf32>
    %18 = vector.extract_strided_slice %17 {offsets = [0, 0], sizes = [1, 32], strides = [1, 1]} : vector<2x32xf32> to vector<1x32xf32>
    %19 = vector.extract_strided_slice %17 {offsets = [1, 0], sizes = [1, 32], strides = [1, 1]} : vector<2x32xf32> to vector<1x32xf32>
    %20 = arith.addf %18, %19 : vector<1x32xf32>
    %21 = arith.negf %20 : vector<1x32xf32>
    %22 = math.exp %21 : vector<1x32xf32>
    %cst_15 = arith.constant 1.000000e+00 : f32
    %23 = vector.broadcast %cst_15 : f32 to vector<1x32xf32>
    %24 = arith.addf %23, %22 : vector<1x32xf32>
    %25 = arith.divf %23, %24 : vector<1x32xf32>
    %26 = vector.shape_cast %25 : vector<1x32xf32> to vector<1x32x1xf32>
    %27 = vector.broadcast %26 : vector<1x32x1xf32> to vector<1x32x128xf32>
    %28 = arith.mulf %0, %27 : vector<1x32x128xf32>
    %cst_16 = arith.constant dense<0xFF800000> : vector<1x128xf32>
    %29 = vector.multi_reduction <maximumf>, %28, %cst_16 [1] : vector<1x32x128xf32> to vector<1x128xf32>
    %cst_17 = arith.constant dense<0.000000e+00> : vector<1x128xf32>
    %30 = vector.multi_reduction <add>, %28, %cst_17 [1] : vector<1x32x128xf32> to vector<1x128xf32>
    %cst_18 = arith.constant 3.200000e+01 : f32
    %31 = vector.broadcast %cst_18 : f32 to vector<1x128xf32>
    %32 = arith.divf %30, %31 : vector<1x128xf32>
    %33 = tpu.concatenate %29, %32 in 0 : vector<1x128xf32>, vector<1x128xf32> -> vector<2x128xf32>
    %34 = tpu.iota {dimensions = array<i32: 0>} : vector<2x128xi32>
    %35 = tpu.iota {dimensions = array<i32: 1>} : vector<2x128xi32>
    %c16_i32 = arith.constant 16 : i32
    %c0_i32 = arith.constant 0 : i32
    %36 = arith.cmpi eq, %c16_i32, %c0_i32 : i32
    %c1_i32 = arith.constant 1 : i32
    %37 = arith.select %36, %c1_i32, %c16_i32 : i32
    %38 = vector.broadcast %37 : i32 to vector<2x128xi32>
    %39 = arith.remsi %35, %38 : vector<2x128xi32>
    %c0_i32_19 = arith.constant 0 : i32
    %40 = vector.broadcast %c0_i32_19 : i32 to vector<2x128xi32>
    %41 = arith.cmpi ne, %39, %40 : vector<2x128xi32>
    %c0_i32_20 = arith.constant 0 : i32
    %42 = vector.broadcast %c0_i32_20 : i32 to vector<2x128xi32>
    %43 = arith.cmpi slt, %39, %42 : vector<2x128xi32>
    %c0_i32_21 = arith.constant 0 : i32
    %44 = arith.cmpi slt, %37, %c0_i32_21 : i32
    %45 = vector.broadcast %44 : i1 to vector<2x128xi1>
    %46 = vector.broadcast %45 : vector<2x128xi1> to vector<2x128xi1>
    %47 = arith.xori %43, %46 : vector<2x128xi1>
    %48 = arith.andi %47, %41 : vector<2x128xi1>
    %49 = vector.broadcast %37 : i32 to vector<2x128xi32>
    %50 = arith.addi %39, %49 : vector<2x128xi32>
    %51 = arith.select %48, %50, %39 : vector<2x128xi1>, vector<2x128xi32>
    %c1_i32_22 = arith.constant 1 : i32
    %52 = vector.broadcast %c1_i32_22 : i32 to vector<2x128xi32>
    %53 = arith.cmpi slt, %34, %52 : vector<2x128xi32>
    %cst_23 = arith.constant 0.000000e+00 : f32
    %54 = vector.broadcast %cst_23 : f32 to vector<2x128xf32>
    %c3_i32 = arith.constant 3 : i32
    %55 = tpu.dynamic_rotate %33 by %c3_i32 dim 1 : vector<2x128xf32>, i32 -> vector<2x128xf32>
    %c0_24 = arith.constant 0 : index
    %c0_25 = arith.constant 0 : index
    %56 = memref.load %arg1[%c0_24, %c0_25] : memref<2x7xf32, #tpu.memory_space<smem>>
    %c1 = arith.constant 1 : index
    %c0_26 = arith.constant 0 : index
    %57 = memref.load %arg1[%c1, %c0_26] : memref<2x7xf32, #tpu.memory_space<smem>>
    %58 = vector.broadcast %56 : f32 to vector<2x128xf32>
    %59 = vector.broadcast %57 : f32 to vector<2x128xf32>
    %60 = arith.select %53, %58, %59 : vector<2x128xi1>, vector<2x128xf32>
    %61 = arith.mulf %60, %55 : vector<2x128xf32>
    %c3_i32_27 = arith.constant 3 : i32
    %62 = vector.broadcast %c3_i32_27 : i32 to vector<2x128xi32>
    %63 = arith.cmpi sge, %51, %62 : vector<2x128xi32>
    %cst_28 = arith.constant 0.000000e+00 : f32
    %64 = vector.broadcast %cst_28 : f32 to vector<2x128xf32>
    %65 = arith.select %63, %61, %64 : vector<2x128xi1>, vector<2x128xf32>
    %66 = arith.addf %54, %65 : vector<2x128xf32>
    %c2_i32 = arith.constant 2 : i32
    %67 = tpu.dynamic_rotate %33 by %c2_i32 dim 1 : vector<2x128xf32>, i32 -> vector<2x128xf32>
    %c0_29 = arith.constant 0 : index
    %c1_30 = arith.constant 1 : index
    %68 = memref.load %arg1[%c0_29, %c1_30] : memref<2x7xf32, #tpu.memory_space<smem>>
    %c1_31 = arith.constant 1 : index
    %c1_32 = arith.constant 1 : index
    %69 = memref.load %arg1[%c1_31, %c1_32] : memref<2x7xf32, #tpu.memory_space<smem>>
    %70 = vector.broadcast %68 : f32 to vector<2x128xf32>
    %71 = vector.broadcast %69 : f32 to vector<2x128xf32>
    %72 = arith.select %53, %70, %71 : vector<2x128xi1>, vector<2x128xf32>
    %73 = arith.mulf %72, %67 : vector<2x128xf32>
    %c2_i32_33 = arith.constant 2 : i32
    %74 = vector.broadcast %c2_i32_33 : i32 to vector<2x128xi32>
    %75 = arith.cmpi sge, %51, %74 : vector<2x128xi32>
    %cst_34 = arith.constant 0.000000e+00 : f32
    %76 = vector.broadcast %cst_34 : f32 to vector<2x128xf32>
    %77 = arith.select %75, %73, %76 : vector<2x128xi1>, vector<2x128xf32>
    %78 = arith.addf %66, %77 : vector<2x128xf32>
    %c1_i32_35 = arith.constant 1 : i32
    %79 = tpu.dynamic_rotate %33 by %c1_i32_35 dim 1 : vector<2x128xf32>, i32 -> vector<2x128xf32>
    %c0_36 = arith.constant 0 : index
    %c2 = arith.constant 2 : index
    %80 = memref.load %arg1[%c0_36, %c2] : memref<2x7xf32, #tpu.memory_space<smem>>
    %c1_37 = arith.constant 1 : index
    %c2_38 = arith.constant 2 : index
    %81 = memref.load %arg1[%c1_37, %c2_38] : memref<2x7xf32, #tpu.memory_space<smem>>
    %82 = vector.broadcast %80 : f32 to vector<2x128xf32>
    %83 = vector.broadcast %81 : f32 to vector<2x128xf32>
    %84 = arith.select %53, %82, %83 : vector<2x128xi1>, vector<2x128xf32>
    %85 = arith.mulf %84, %79 : vector<2x128xf32>
    %c1_i32_39 = arith.constant 1 : i32
    %86 = vector.broadcast %c1_i32_39 : i32 to vector<2x128xi32>
    %87 = arith.cmpi sge, %51, %86 : vector<2x128xi32>
    %cst_40 = arith.constant 0.000000e+00 : f32
    %88 = vector.broadcast %cst_40 : f32 to vector<2x128xf32>
    %89 = arith.select %87, %85, %88 : vector<2x128xi1>, vector<2x128xf32>
    %90 = arith.addf %78, %89 : vector<2x128xf32>
    %c0_41 = arith.constant 0 : index
    %c3 = arith.constant 3 : index
    %91 = memref.load %arg1[%c0_41, %c3] : memref<2x7xf32, #tpu.memory_space<smem>>
    %c1_42 = arith.constant 1 : index
    %c3_43 = arith.constant 3 : index
    %92 = memref.load %arg1[%c1_42, %c3_43] : memref<2x7xf32, #tpu.memory_space<smem>>
    %93 = vector.broadcast %91 : f32 to vector<2x128xf32>
    %94 = vector.broadcast %92 : f32 to vector<2x128xf32>
    %95 = arith.select %53, %93, %94 : vector<2x128xi1>, vector<2x128xf32>
    %96 = arith.mulf %95, %33 : vector<2x128xf32>
    %97 = arith.addf %90, %96 : vector<2x128xf32>
    %c127_i32 = arith.constant 127 : i32
    %98 = tpu.dynamic_rotate %33 by %c127_i32 dim 1 : vector<2x128xf32>, i32 -> vector<2x128xf32>
    %c0_44 = arith.constant 0 : index
    %c4 = arith.constant 4 : index
    %99 = memref.load %arg1[%c0_44, %c4] : memref<2x7xf32, #tpu.memory_space<smem>>
    %c1_45 = arith.constant 1 : index
    %c4_46 = arith.constant 4 : index
    %100 = memref.load %arg1[%c1_45, %c4_46] : memref<2x7xf32, #tpu.memory_space<smem>>
    %101 = vector.broadcast %99 : f32 to vector<2x128xf32>
    %102 = vector.broadcast %100 : f32 to vector<2x128xf32>
    %103 = arith.select %53, %101, %102 : vector<2x128xi1>, vector<2x128xf32>
    %104 = arith.mulf %103, %98 : vector<2x128xf32>
    %c15_i32 = arith.constant 15 : i32
    %105 = vector.broadcast %c15_i32 : i32 to vector<2x128xi32>
    %106 = arith.cmpi slt, %51, %105 : vector<2x128xi32>
    %cst_47 = arith.constant 0.000000e+00 : f32
    %107 = vector.broadcast %cst_47 : f32 to vector<2x128xf32>
    %108 = arith.select %106, %104, %107 : vector<2x128xi1>, vector<2x128xf32>
    %109 = arith.addf %97, %108 : vector<2x128xf32>
    %c126_i32 = arith.constant 126 : i32
    %110 = tpu.dynamic_rotate %33 by %c126_i32 dim 1 : vector<2x128xf32>, i32 -> vector<2x128xf32>
    %c0_48 = arith.constant 0 : index
    %c5 = arith.constant 5 : index
    %111 = memref.load %arg1[%c0_48, %c5] : memref<2x7xf32, #tpu.memory_space<smem>>
    %c1_49 = arith.constant 1 : index
    %c5_50 = arith.constant 5 : index
    %112 = memref.load %arg1[%c1_49, %c5_50] : memref<2x7xf32, #tpu.memory_space<smem>>
    %113 = vector.broadcast %111 : f32 to vector<2x128xf32>
    %114 = vector.broadcast %112 : f32 to vector<2x128xf32>
    %115 = arith.select %53, %113, %114 : vector<2x128xi1>, vector<2x128xf32>
    %116 = arith.mulf %115, %110 : vector<2x128xf32>
    %c14_i32 = arith.constant 14 : i32
    %117 = vector.broadcast %c14_i32 : i32 to vector<2x128xi32>
    %118 = arith.cmpi slt, %51, %117 : vector<2x128xi32>
    %cst_51 = arith.constant 0.000000e+00 : f32
    %119 = vector.broadcast %cst_51 : f32 to vector<2x128xf32>
    %120 = arith.select %118, %116, %119 : vector<2x128xi1>, vector<2x128xf32>
    %121 = arith.addf %109, %120 : vector<2x128xf32>
    %c125_i32 = arith.constant 125 : i32
    %122 = tpu.dynamic_rotate %33 by %c125_i32 dim 1 : vector<2x128xf32>, i32 -> vector<2x128xf32>
    %c0_52 = arith.constant 0 : index
    %c6 = arith.constant 6 : index
    %123 = memref.load %arg1[%c0_52, %c6] : memref<2x7xf32, #tpu.memory_space<smem>>
    %c1_53 = arith.constant 1 : index
    %c6_54 = arith.constant 6 : index
    %124 = memref.load %arg1[%c1_53, %c6_54] : memref<2x7xf32, #tpu.memory_space<smem>>
    %125 = vector.broadcast %123 : f32 to vector<2x128xf32>
    %126 = vector.broadcast %124 : f32 to vector<2x128xf32>
    %127 = arith.select %53, %125, %126 : vector<2x128xi1>, vector<2x128xf32>
    %128 = arith.mulf %127, %122 : vector<2x128xf32>
    %c13_i32 = arith.constant 13 : i32
    %129 = vector.broadcast %c13_i32 : i32 to vector<2x128xi32>
    %130 = arith.cmpi slt, %51, %129 : vector<2x128xi32>
    %cst_55 = arith.constant 0.000000e+00 : f32
    %131 = vector.broadcast %cst_55 : f32 to vector<2x128xf32>
    %132 = arith.select %130, %128, %131 : vector<2x128xi1>, vector<2x128xf32>
    %133 = arith.addf %121, %132 : vector<2x128xf32>
    %134 = vector.extract_strided_slice %133 {offsets = [0, 0], sizes = [1, 128], strides = [1, 1]} : vector<2x128xf32> to vector<1x128xf32>
    %135 = vector.extract_strided_slice %133 {offsets = [1, 0], sizes = [1, 128], strides = [1, 1]} : vector<2x128xf32> to vector<1x128xf32>
    %136 = arith.addf %134, %135 : vector<1x128xf32>
    %c0_56 = arith.constant 0 : index
    %137 = memref.load %arg2[%c0_56] : memref<1xf32, #tpu.memory_space<smem>>
    %138 = vector.broadcast %137 : f32 to vector<1x128xf32>
    %139 = arith.addf %136, %138 : vector<1x128xf32>
    %140 = arith.negf %139 : vector<1x128xf32>
    %141 = math.exp %140 : vector<1x128xf32>
    %cst_57 = arith.constant 1.000000e+00 : f32
    %142 = vector.broadcast %cst_57 : f32 to vector<1x128xf32>
    %143 = arith.addf %142, %141 : vector<1x128xf32>
    %144 = arith.divf %142, %143 : vector<1x128xf32>
    %145 = vector.shape_cast %144 : vector<1x128xf32> to vector<1x1x128xf32>
    %146 = vector.broadcast %145 : vector<1x1x128xf32> to vector<1x32x128xf32>
    %147 = arith.mulf %28, %146 : vector<1x32x128xf32>
    %c0_58 = arith.constant 0 : index
    %c0_59 = arith.constant 0 : index
    %c0_60 = arith.constant 0 : index
    %148 = vector.load %arg8[%c0_58, %c0_59, %c0_60] : memref<1x32x128xf32, #tpu.memory_space<vmem>>, vector<1x32x128xf32>
    tpu.vector_store %arg8[%c0_58, %c0_59, %c0_60], %147 {strides = array<i32>} : memref<1x32x128xf32, #tpu.memory_space<vmem>>, vector<1x32x128xf32>,
    return
  }
  func.func @transform_0(%arg0: i32) -> (i32, i32) {
    %c0_i32 = arith.constant 0 : i32
    %c0_i32_0 = arith.constant 0 : i32
    %c0_i32_1 = arith.constant 0 : i32
    return %c0_i32, %c0_i32_0 : i32, i32
  }
  func.func @transform_1(%arg0: i32) -> i32 {
    %c0_i32 = arith.constant 0 : i32
    %c0_i32_0 = arith.constant 0 : i32
    return %c0_i32 : i32
  }
  func.func @transform_2(%arg0: i32) -> (i32, i32, i32) {
    %c0_i32 = arith.constant 0 : i32
    %c0_i32_0 = arith.constant 0 : i32
    %c0_i32_1 = arith.constant 0 : i32
    return %arg0, %c0_i32, %c0_i32_0 : i32, i32, i32
  }
  func.func @transform_3(%arg0: i32) -> (i32, i32) {
    %c0_i32 = arith.constant 0 : i32
    %c0_i32_0 = arith.constant 0 : i32
    %c0_i32_1 = arith.constant 0 : i32
    return %c0_i32, %c0_i32_0 : i32, i32
  }
  func.func @transform_4(%arg0: i32) -> (i32, i32) {
    %c0_i32 = arith.constant 0 : i32
    %c0_i32_0 = arith.constant 0 : i32
    %c0_i32_1 = arith.constant 0 : i32
    return %c0_i32, %c0_i32_0 : i32, i32
  }
  func.func @transform_5(%arg0: i32) -> (i32, i32) {
    %c0_i32 = arith.constant 0 : i32
    %c0_i32_0 = arith.constant 0 : i32
    %c0_i32_1 = arith.constant 0 : i32
    return %c0_i32, %c0_i32_0 : i32, i32
  }
  func.func @transform_6(%arg0: i32) -> (i32, i32) {
    %c0_i32 = arith.constant 0 : i32
    %c0_i32_0 = arith.constant 0 : i32
    %c0_i32_1 = arith.constant 0 : i32
    return %c0_i32, %c0_i32_0 : i32, i32
  }
  func.func @transform_7(%arg0: i32) -> (i32, i32, i32) {
    %c0_i32 = arith.constant 0 : i32
    %c0_i32_0 = arith.constant 0 : i32
    %c0_i32_1 = arith.constant 0 : i32
    return %arg0, %c0_i32, %c0_i32_0 : i32, i32, i32
  }
}

</mosaic_0001>

<bundles_post_ra>
// kernel: tpu_custom_call.1
= control target key start
LH: loop header
LB: loop body
LE: loop exit
PB: predicated region body
PF: predicated region fallthrough
CT: control target
= control target key end

     0   :  { %s1478_s0 = inlined_call_operand.vmem [shape: f32[2,7], index: 0, kind: input, shape index: {}]   ;;  %s1479_s1 = inlined_call_operand.<no memory space> [shape: f32[1], index: 1, kind: input, shape index: {}]   ;;  %s1480_s2 = inlined_call_operand.hbm [shape: f32[2,32,128], index: 2, kind: input, shape index: {}]   ;;  %s1481_s3 = inlined_call_operand.vmem [shape: f32[32,2], index: 3, kind: input, shape index: {}]   ;;  %s1482_s4 = inlined_call_operand.vmem [shape: f32[1,2], index: 4, kind: input, shape index: {}]   ;;  %s1483_s5 = inlined_call_operand.vmem [shape: f32[2,32], index: 5, kind: input, shape index: {}]   ;;  %s1484_s6 = inlined_call_operand.vmem [shape: f32[1,32], index: 6, kind: input, shape index: {}]   ;;  %s1485_s7 = inlined_call_operand.hbm [shape: f32[2,32,128], index: 7, kind: output, shape index: {}]  }
   0x1   :  { %12 = sst [smem:[#allocation2]] %s1479_s1 }
   0x2   :  { %13 = vsyncpa [#allocation6], 0 }
   0x3   :  { %14 = vsyncpa [#allocation4], 0 }
   0x4   :  { %16 = vsyncpa [#allocation4 + $0x1], 0 }
   0x5   :  { %17 = vsyncpa [#allocation5], 0 }
   0x6   :  { %19 = vsyncpa [#allocation5 + $0x1], 0  ;;  %s1154_s26 = smov 0   ;;  %s1156_s27 = smov 0  }
   0x7   :  { %s1158_s28 = smov 0   ;;  %s1160_s29 = smov 0  }
   0x8 LB: > { %s1175_s1 = sadd.s32 4294967295, %s1093_s29   ;;  %s833_s30 = sadd.s32 4294967294, %s1093_s29   ;;  %s1093_s29 = sphi %s1160_s29, %s1507_s29   ;;  %s1089_s28 = sphi %s1158_s28, %s1506_s28   ;;  %s1085_s27 = sphi %s1156_s27, %s1505_s27   ;;  %s1081_s26 = sphi %s1154_s26, %s1504_s26  }
   0x9   : > { %s1179_s8 = sadd.s32 1, %s1093_s29   ;;  %s74_s9 = sadd.s32 1, %s1089_s28 }
   0xa   : > { %s71_s10 = ssub.s32 %s1093_s29, %s1179_s8  ;;  %p81_p0 = scmp.ne.s32.totalorder %s1089_s28, %s1085_s27 }
   0xb   : > { %p72_p1 = scmp.eq.s32.totalorder %s71_s10, 0  ;;  %p82_p2 = scmp.eq.s32.totalorder %s1093_s29, 0 }
   0xc   : > { %p87_p3 = scmp.ne.s32.totalorder %s1085_s27, %s1081_s26  ;;  %p1487_p4 = scmp.eq.s32.totalorder %s1175_s1, 0 }
   0xd   : > { %s1191_s11 = scalar_select %p72_p1, %s1089_s28, %s74_s9  }
   0xe   : > { %p1193_p5 = por %p82_p2, %p81_p0  ;;  %p1199_p6 = por %p1487_p4, %p87_p3 }
   0xf   : > { %p195_p7 = scmp.eq.s32.totalorder %s1175_s1, 1  ;;  %p201_p8 = scmp.eq.s32.totalorder %s833_s30, 1 }
  0x10   : > { %s1491_s13 = scalar_select %p1199_p6, 1, 0 }
  0x11   : > { %p834_p9 = scmp.ge.s32.totalorder %s1093_s29, 1  ;;  %p208_p10 = scmp.lt.s32.totalorder %s1093_s29, 3 }
  0x12   : > { %p1206_p11 = por %p195_p7, %p81_p0  ;;  %p1210_p12 = por %p201_p8, %p87_p3 }
  0x13   : > { %p1214_p13 = pnand %p834_p9, %p208_p10  ;;  %s221_s19 = sshll.u32 %s1478_s0, 4  ;;  %s222_s19 = int_to_ptr.vmem [resolvable:$true] %s221_s19 }
  0x14   : > { %s1492_s14 = scalar_select %p1206_p11, 1, 0 }
  0x15   : > { %s1493_s15 = scalar_select %p1210_p12, 1, 0 }
  0x16   : > { %p908_p1 = pneg %p1214_p13  ;;  %p921_p2 = scmp.lt.s32.totalorder %s1093_s29, 2 }
  0x17   : > { %s247_s21 = sand.u32 1, %s1089_s28   ;;  %s978_s24 = scalar_lea.vmem %s222_s19, 32 }
  0x18   : > { %p1227_p7 = pnand %p908_p1, %p1487_p4  ;;  %p1234_p3 = pnand %p921_p2, %p1193_p5 }
  0x19   : > { %s837_s23 = sshll.u32 %s247_s21, 5  ;;  %p979_p8 = scmp.ne.s32.totalorder %s222_s19, %s978_s24 }
  0x1a   : > { %p980_p9 = pneg %p1227_p7  ;;  %p986_p12 = scmp.lt.s32.totalorder %s222_s19, %s222_s19 }
  0x1b   : > { %p987_p11 = scmp.lt.s32.totalorder %s978_s24, %s978_s24 }
  0x1c   : > { %p981_p10 = pnand %p980_p9, %p979_p8 }
  0x1d   : > { %p988_p1 = por %p987_p11, %p986_p12 }
  0x1e   : > { %p982_p0 = pneg %p981_p10 }
  0x20   : > { %p989_p4 = pnand %p988_p1, %p982_p0 }
  0x22   : > { %992 = shalt.err (!%p989_p4)
}
  0x23   : > { %s1095_s25 = smov [#allocation3]   ;;  %s869_s30 = sshll.u32 %s1093_s29, 9 }
  0x24   : > { %911 = dma.vmem_to_smem (!%p1227_p7), %s222_s19, 32, %s1095_s25, [#allocation6]  }
  0x25   : > { %s251_s9 = scalar_lea.vmem [#allocation7], %s837_s23  ;;  %s1246_s18 = scalar_lea.hbm %s1480_s2, %s869_s30 }
  0x26   : > { %s258_s10 = sshll.u32 %s251_s9, 4  ;;  %s1250_s24 = scalar_lea.sflag [#allocation4], %s247_s21  ;;  %s1248_s10 = int_to_ptr.vmem [resolvable:$true] %s258_s10 }
  0x27   : > { %s993_s20 = scalar_lea.hbm %s1246_s18, 512  ;;  %p995_p5 = pneg %p1234_p3 }
  0x28   : > { %p994_p4 = scmp.ne.s32.totalorder %s1246_s18, %s993_s20  ;;  %s998_s25 = scalar_lea.hbm %s1480_s2, 1024 }
  0x29   : > { %p999_p0 = scmp.lt.u32.totalorder %s1246_s18, %s1480_s2  ;;  %p1000_p2 = scmp.lt.u32.totalorder %s998_s25, %s993_s20 }
  0x2a   : > { %p996_p11 = pnand %p995_p5, %p994_p4  ;;  %p1002_p8 = scmp.lt.u32.totalorder %s993_s20, %s1246_s18 }
  0x2b   : > { %p1001_p7 = por %p1000_p2, %p999_p0 }
  0x2c   : > { %p997_p12 = pneg %p996_p11 }
  0x2d   : > { %p1003_p9 = por %p1002_p8, %p1001_p7 }
  0x2f   : > { %p1004_p10 = pnand %p1003_p9, %p997_p12 }
  0x31   : > { %1007 = shalt.err (!%p1004_p10)
}
  0x32   : > { %s1008_s21 = scalar_lea.vmem %s1248_s10, 512  ;;  %s1096_s12 = smov [#allocation7]  }
  0x33   : > { %p1009_p1 = scmp.ne.s32.totalorder %s1248_s10, %s1008_s21  ;;  %s1013_s17 = sshll.u32 %s1096_s12, 4  ;;  %s1014_s17 = int_to_ptr.vmem [resolvable:$false] %s1013_s17 }
  0x34   : > { %s1015_s19 = scalar_lea.vmem %s1014_s17, 1024  ;;  %p1016_p6 = scmp.lt.s32.totalorder %s1248_s10, %s1014_s17 }
  0x35   : > { %p1011_p4 = pnand %p1009_p1, %p995_p5  ;;  %p1017_p0 = scmp.lt.s32.totalorder %s1015_s19, %s1008_s21 }
  0x37   : > { %p1012_p11 = pneg %p1011_p4  ;;  %p1018_p2 = por %p1017_p0, %p1016_p6 }
  0x39   : > { %p1019_p7 = pnand %p1018_p2, %p1012_p11 }
  0x3b   : > { %1022 = shalt.err (!%p1019_p7)
}
  0x3c   : > { %s1097_s20 = smov 128   ;;  %s1098_s23 = smov 8  }
  0x3d   : > { %915 = dma.hbm_to_vmem [thread:$0]  (!%p1234_p3), %s1246_s18, 512, %s1248_s10, %s1250_s24, %s1097_s20, %s1097_s20, %s1098_s23  }
  0x3e   : > { %270 = sbr.rel (%p1214_p13) target bundleno = 1024 (0x400), region = 48  ;;  %p1497_p5 = scmp.eq.s32.totalorder (!%p1214_p13), %s1175_s1, 0 }
  0x45   : > { %1068 = dma.done.wait (%p1497_p5), [#allocation6], 32   ;;  %p1498_p12 = pmov %p1497_p5 }
  0x46   : > { %s1285_s25 = sand.u32 1, %s1085_s27   ;;  %p1499_p6 = scmp.ne.s32.totalorder %s1491_s13, 0 }
  0x47   : > { %1070 = vsyncadd (%p1498_p12), [#allocation6], 4294967264  ;;  %s1489_s30 = sshll.u32 %s1285_s25, 5  ;;  %s277_s9 = scalar_lea.sflag [#allocation4], %s1285_s25 }
  0x48   : > { %s280_s22 = scalar_lea.vmem [#allocation7], %s1489_s30 }
  0x49   : > { %1072 = dma.done.wait (%p1499_p6), %s277_s9, 512  }
  0x4a   : > { %1074 = vsyncadd (%p1499_p6), %s277_s9, 4294966784 }
  0x4b   : > { %285 = sfence }
  0x4c   : > { %v1295_v0 = vld [vmem:[%s280_s22 + $0x10] sm:$0xff]  ;;  %v1297_v1 = vld [vmem:[%s280_s22] sm:$0xff]  ;;  %v1301_v2 = vld [vmem:[%s280_s22 + $0x18] sm:$0xff]  ;;  %v1099_v7 = vmov 0.0|0.0   ;;  %vm1100_vm0 = vmmov 0   ;;  %v1101_v11 = vmov 0.0   ;;  %v341_v12 = vlaneseq }
  0x4d   : > { %320 = vadd.xlane.f32.xlu1 %v1295_v0  ;;  %316 = vadd.xlane.f32.xlu0 %v1297_v1  ;;  %v1303_v3 = vld [vmem:[%s280_s22 + $0x8] sm:$0xff]  ;;  %v395_v4 = vld [vmem:[%s1481_s3] sm:$0xff]  ;;  %v397_v8 = vld [vmem:[%s1481_s3 + $0x10] sm:$0xff]  ;;  %vm352_vm1 = vcmask 130112   ;;  %vm359_vm2 = vcmask 195712   ;;  %vm366_vm3 = vcmask 261312  }
  0x4e   : > { %v396_v5 = vld [vmem:[%s1481_s3 + $0x8] sm:$0xff]  ;;  %894 = vmatprep.subr.bf16.mxu0 %v1099_v7  ;;  %v398_v9 = vld [vmem:[%s1481_s3 + $0x18] sm:$0xff]  ;;  %886 = vmatprep.mubr.msk.f32.mxu0 %vm1100_vm0, %v1101_v11  ;;  %v1323_v13 = vand.u32 127, %v341_v12  ;;  %v1326_v15 = vshrl.u32 %v341_v12, 7  ;;  %vm393_vm4 = vcmask 1040384   ;;  %vm406_vm5 = vcmask 261120  }
  0x4f   : > { %v895_v6 = vpack.c.bf16 %v396_v5, %v395_v4  ;;  %v898_v10 = vpack.c.bf16 %v398_v9, %v397_v8  ;;  %889 = vmatprep.subr.mxu1 %v1101_v11  ;;  %891 = vmatprep.mubr.msk.f32.mxu1 %vm1100_vm0, %v1101_v11  ;;  %v481_v49 = vld [vmem:[%s1483_s5] sm:$0x3]  ;;  %vm493_vm6 = vcmask 1041408   ;;  %vm489_vm7 = vcmask 15360   ;;  %s1102_s16 = smov 2   ;;  %s1103_s10 = smov 3  }
  0x50   : > { %v347_v14 = vadd.s32 4294967288, %v1323_v13  ;;  %v354_v18 = vadd.s32 4294967280, %v1323_v13  ;;  %v345_v20 = vsub.s32 %v1323_v13, %v1326_v15  ;;  %v361_v22 = vadd.s32 4294967272, %v1323_v13  ;;  %890 = vmatpush3.msk.msra.mxu1 %vm493_vm6, %v481_v49  ;;  %v844_v50 = vld [vmem:[%s1482_s4] ss:$0 sm:$0xff]  ;;  %s1104_s18 = smov 127  }
  0x51   : > { %322 = vadd.xlane.f32.xlu1 %v1301_v2  ;;  %318 = vadd.xlane.f32.xlu0 %v1303_v3  ;;  %v846_v55 = vld [vmem:[%s1484_s6] ss:$0 sm:$0xff]  ;;  %v579_v4 = vsub.s32 0, %v1326_v15  ;;  %s1105_s24 = smov 1   ;;  %s1106_s21 = smov 125   ;;  %vm635_vm8 = vcmp.lt.s32.totalorder %v1326_v15, 1 }
  0x52   : > { %896 = vmatpush3.bf16.msra.mxu0 %v895_v6  ;;  %v350_v19 = vsub.s32 %v347_v14, %v1326_v15  ;;  %v357_v26 = vsub.s32 %v354_v18, %v1326_v15  ;;  %v364_v30 = vsub.s32 %v361_v22, %v1326_v15  ;;  %s1107_s12 = smov 126   ;;  %s851_s17 = sld [smem:[#allocation3 + $0x1]] }
  0x53   : > { %897 = vmatprep.subr.bf16.mxu0 %v1099_v7  ;;  %s852_s19 = sld [smem:[#allocation3 + $0x81]]  ;;  %s638_s20 = sld [smem:[#allocation3]] }
  0x54   : > { %s850_s23 = sld [smem:[#allocation3 + $0x80]]  ;;  %s853_s9 = sld [smem:[#allocation3 + $0x2]] }
  0x55   : > { %331 = vmax.xlane.f32.xlu1 %v1303_v3  ;;  %329 = vmax.xlane.f32.xlu0 %v1297_v1  ;;  %s854_s22 = sld [smem:[#allocation3 + $0x82]]  ;;  %s1379_s13 = sld [smem:[#allocation3 + $0x4]] }
  0x56   : > { %899 = vmatpush3.bf16.msra.mxu0 %v898_v10  ;;  %s1395_s30 = sld [smem:[#allocation3 + $0x86]]  ;;  %p1501_p3 = scmp.ne.s32.totalorder %s1492_s14, 0 }
  0x59   : > { %333 = vmax.xlane.f32.xlu0 %v1295_v0  ;;  %335 = vmax.xlane.f32.xlu1 %v1301_v2 }
  0xda   : > { %v321_v16 = vpop.xlane.xlu1 %320  ;;  %v317_v17 = vpop.xlane.xlu0 %316 }
  0xdb   : > { %v325_v21 = vmul.f32 0.0078125, %v317_v17  ;;  %v327_v27 = vmul.f32 0.0078125, %v321_v16 }
  0xdd   : > { %v346_v29 = vrot.slane %v325_v21, %v345_v20  ;;  %v358_v37 = vrot.slane %v327_v27, %v357_v26 }
  0xde   : > { %v323_v23 = vpop.xlane.xlu1 %322  ;;  %v319_v24 = vpop.xlane.xlu0 %318 }
  0xdf   : > { %v326_v25 = vmul.f32 0.0078125, %v319_v24  ;;  %v328_v31 = vmul.f32 0.0078125, %v323_v23 }
  0xe1   : > { %v351_v28 = vrot.slane %v326_v25, %v350_v19  ;;  %v365_v38 = vrot.slane %v328_v31, %v364_v30 }
  0xe2   : > { %v332_v32 = vpop.xlane.xlu1 %331  ;;  %v330_v33 = vpop.xlane.xlu0 %329 }
  0xe3   : > { %v353_v34 = vsel %vm352_vm1, %v351_v28, %v346_v29  ;;  %v380_v35 = vrot.slane %v332_v32, %v350_v19  ;;  %v376_v36 = vrot.slane %v330_v33, %v345_v20  ;;  %v651_v33 = vstv %s851_s17  ;;  %s870_s17 = sshll.u32 %s1175_s1, 9  ;;  %s735_s1 = scalar_lea.sflag [#allocation5], %s1285_s25 }
  0xe4   : > { %v360_v43 = vsel %vm359_vm2, %v358_v37, %v353_v34  ;;  %v652_v34 = vstv %s852_s19  ;;  %v627_v37 = vand.u32 15, %v1323_v13  ;;  %s1500_s19 = sshll.u32 %s1285_s25, 5 }
  0xe5   : > { %v381_v44 = vsel %vm352_vm1, %v380_v35, %v376_v36  ;;  %v367_v47 = vsel %vm366_vm3, %v365_v38, %v360_v43  ;;  %v640_v35 = vstv %s638_s20  ;;  %v641_v36 = vstv %s850_s23  ;;  %s311_s20 = scalar_lea.vmem [#allocation8], %s1500_s19 }
  0xe6   : > { %v334_v39 = vpop.xlane.xlu0 %333  ;;  %v336_v40 = vpop.xlane.xlu1 %335  ;;  %v653_v38 = vsel %vm635_vm8, %v651_v33, %v652_v34  ;;  %vm655_vm9 = vcmp.ge.s32.totalorder %v627_v37, 2  ;;  %vm644_vm10 = vcmp.ge.s32.totalorder %v627_v37, 3  ;;  %vm666_vm11 = vcmp.ge.s32.totalorder %v627_v37, 1  ;;  %s748_s23 = sshll.u32 %s311_s20, 4  ;;  %s1430_s23 = int_to_ptr.vmem [resolvable:$true] %s748_s23 }
  0xe7   : > { %v385_v41 = vrot.slane %v334_v39, %v357_v26  ;;  %v390_v42 = vrot.slane %v336_v40, %v364_v30  ;;  %v642_v39 = vsel %vm635_vm8, %v640_v35, %v641_v36  ;;  %v662_v40 = vstv %s853_s9 }
  0xe8   : > { %vm684_vm12 = vcmp.lt.s32.totalorder %v627_v37, 15  ;;  %vm695_vm13 = vcmp.lt.s32.totalorder %v627_v37, 14  ;;  %vm706_vm14 = vcmp.lt.s32.totalorder %v627_v37, 13 }
  0xe9   : > { %v386_v45 = vsel %vm359_vm2, %v385_v41, %v381_v44  ;;  %v663_v41 = vstv %s854_s22 }
  0xea   : > { %v391_v46 = vsel %vm366_vm3, %v390_v42, %v386_v45  ;;  %v680_v45 = vstv %s1379_s13  ;;  %s1428_s13 = scalar_lea.hbm %s1485_s7, %s870_s17 }
  0xeb   : > { %v394_v48 = vsel %vm393_vm4, %v367_v47, %v391_v46  ;;  %v664_v47 = vsel %vm635_vm8, %v662_v40, %v663_v41 }
  0xec   : > { %887 = vmatmul.mubr.msk.f32.vlgmr.msra.gmra.mrb[0].mxu0 %vm406_vm5, %v394_v48 }
 0x1bf   : > { %v476_v51 = vpop.f32.mrb[0].mxu0 }
 0x1c0   : > { %v477_v52 = vadd.f32 %v844_v50, %v476_v51  ;;  %v888_v53 = vpop.f32.mrb[1].mxu0 }
 0x1c2   : > { %v480_v54 = vmax.f32 %v477_v52, 0.0 }
 0x1c4   : > { %892 = vmatmul.mubr.msk.f32.vlgmr.msra.gmra.mrb[0].mxu1 %vm489_vm7, %v480_v54 }
 0x297   : > { %v563_v56 = vpop.f32.mrb[0].mxu1 }
 0x298   : > { %v564_v57 = vadd.f32 %v846_v55, %v563_v56  ;;  %v893_v58 = vpop.f32.mrb[1].mxu1 }
 0x29a   : > { %v568_v59 = vrot.slane %v564_v57, 1 }
 0x29c   : > { %v570_v60 = vadd.f32 %v568_v59, %v564_v57 }
 0x29e   : > { %v849_v61 = vmul.f32 -1.442695, %v570_v60  ;;  %v703_v60 = vstv %s1395_s30  ;;  %s713_s30 = sld [smem:[#allocation2]] }
 0x2a0   : > { %970 = vpow2.f32 %v849_v61 }
 0x2aa   : > { %v971_v62 = vpop.eup %970 }
 0x2ab   : > { %v574_v63 = vadd.f32 1.0, %v971_v62 }
 0x2ad   : > { %972 = vrcp.f32 %v574_v63 }
 0x2b7   : > { %v973_v5 = vpop.eup %972 }
 0x2b8   : > { %v580_v6 = vrot.slane %v973_v5, %v579_v4 }
 0x2ba   : > { %586 = vbcast.lane.b32.xlu1 %v580_v6, 264  ;;  %582 = vbcast.lane.b32.xlu0 %v580_v6, 256 }
 0x2be   : > { %590 = vbcast.lane.b32.xlu1 %v580_v6, 272 }
 0x2c2   : > { %594 = vbcast.lane.b32.xlu1 %v580_v6, 280 }
 0x32c   : > { %v587_v7 = vpop.permute.xlu1 %586  ;;  %v583_v8 = vpop.permute.xlu0 %582 }
 0x32d   : > { %v1351_v9 = vmul.f32 %v587_v7, %v1303_v3  ;;  %v1354_v10 = vmul.f32 %v583_v8, %v1297_v1 }
 0x32f   : > { %v609_v14 = vadd.f32 %v1351_v9, %v1354_v10  ;;  %v600_v3 = vmax.f32 %v1354_v10, %v1351_v9 }
 0x330   : > { %v591_v11 = vpop.permute.xlu1 %590 }
 0x331   : > { %v1357_v12 = vmul.f32 %v591_v11, %v1295_v0 }
 0x333   : > { %v610_v17 = vadd.f32 %v609_v14, %v1357_v12 }
 0x334   : > { %v595_v16 = vpop.permute.xlu1 %594 }
 0x335   : > { %v1363_v18 = vmul.f32 %v595_v16, %v1301_v2 }
 0x337   : > { %v601_v1 = vmax.f32 %v1357_v12, %v1363_v18  ;;  %v611_v19 = vadd.f32 %v610_v17, %v1363_v18 }
 0x339   : > { %v602_v20 = vmax.f32 %v600_v3, %v601_v1  ;;  %v612_v0 = vrot.slane %v611_v19, 4 }
 0x33b   : > { %v603_v21 = vrot.slane %v602_v20, 4  ;;  %v613_v22 = vadd.f32 %v612_v0, %v611_v19 }
 0x33d   : > { %v604_v23 = vmax.f32 %v602_v20, %v603_v21  ;;  %v614_v24 = vrot.slane %v613_v22, 2 }
 0x33f   : > { %v605_v25 = vrot.slane %v604_v23, 2  ;;  %v615_v26 = vadd.f32 %v614_v24, %v613_v22  ;;  %v714_v24 = vstv %s713_s30 }
 0x341   : > { %v606_v27 = vmax.f32 %v604_v23, %v605_v25  ;;  %v616_v28 = vrot.slane %v615_v26, 1 }
 0x343   : > { %v607_v2 = vrot.slane %v606_v27, 1  ;;  %v617_v29 = vadd.f32 %v616_v28, %v615_v26 }
 0x345   : > { %v608_v30 = vmax.f32 %v606_v27, %v607_v2  ;;  %v619_v31 = vmul.f32 0.03125, %v617_v29 }
 0x347   : > { %v1371_v32 = vsel %vm393_vm4, %v608_v30, %v619_v31 }
 0x348   : > { %647 = vrot.lane.b32.xlu1 %v1371_v32, %s1102_s16  ;;  %636 = vrot.lane.b32.xlu0 %v1371_v32, %s1103_s10  ;;  %s1381_s16 = sld [smem:[#allocation3 + $0x84]]  ;;  %s1383_s10 = sld [smem:[#allocation3 + $0x3]] }
 0x34c   : > { %676 = vrot.lane.b32.xlu1 %v1371_v32, %s1104_s18  ;;  %658 = vrot.lane.b32.xlu0 %v1371_v32, %s1105_s24  ;;  %s1385_s18 = sld [smem:[#allocation3 + $0x83]]  ;;  %s1387_s24 = sld [smem:[#allocation3 + $0x5]] }
 0x34e   : > { %v681_v46 = vstv %s1381_s16  ;;  %v671_v48 = vstv %s1383_s10  ;;  %s1023_s16 = scalar_lea.vmem %s1430_s23, 512  ;;  %s1108_s10 = smov [#allocation8]  }
 0x34f   : > { %v682_v54 = vsel %vm635_vm8, %v680_v45, %v681_v46  ;;  %p1024_p13 = scmp.ne.s32.totalorder %s1430_s23, %s1023_s16 }
 0x350   : > { %698 = vrot.lane.b32.xlu1 %v1371_v32, %s1106_s21  ;;  %687 = vrot.lane.b32.xlu0 %v1371_v32, %s1107_s12  ;;  %s1389_s21 = sld [smem:[#allocation3 + $0x85]]  ;;  %s1393_s12 = sld [smem:[#allocation3 + $0x6]] }
 0x351   : > { %p1025_p8 = pnand %p1024_p13, %p1501_p3 }
 0x352   : > { %v672_v49 = vstv %s1385_s18  ;;  %v691_v52 = vstv %s1387_s24  ;;  %s1027_s18 = sshll.u32 %s1108_s10, 4  ;;  %s1028_s18 = int_to_ptr.vmem [resolvable:$false] %s1027_s18 }
 0x353   : > { %v673_v57 = vsel %vm635_vm8, %v671_v48, %v672_v49  ;;  %p1026_p9 = pneg %p1025_p8  ;;  %s1029_s24 = scalar_lea.vmem %s1028_s18, 1024 }
 0x354   : > { %v674_v7 = vmul.f32 %v673_v57, %v1371_v32  ;;  %p1030_p10 = scmp.lt.s32.totalorder %s1430_s23, %s1028_s18  ;;  %p1031_p1 = scmp.lt.s32.totalorder %s1029_s24, %s1023_s16 }
 0x356   : > { %v692_v53 = vstv %s1389_s21  ;;  %v702_v59 = vstv %s1393_s12  ;;  %p1032_p4 = por %p1031_p1, %p1030_p10 }
 0x357   : > { %v693_v62 = vsel %vm635_vm8, %v691_v52, %v692_v53  ;;  %v704_v8 = vsel %vm635_vm8, %v702_v59, %v703_v60 }
 0x358   : > { %p1033_p11 = pnand %p1032_p4, %p1026_p9 }
 0x3ba   : > { %v648_v13 = vpop.permute.xlu1 %647  ;;  %v637_v42 = vpop.permute.xlu0 %636 }
 0x3bb   : > { %v654_v43 = vmul.f32 %v653_v38, %v648_v13  ;;  %v643_v44 = vmul.f32 %v642_v39, %v637_v42 }
 0x3bd   : > { %v656_v50 = vsel %vm655_vm9, %v654_v43, 0.0  ;;  %v645_v51 = vsel %vm644_vm10, %v643_v44, 0.0 }
 0x3be   : > { %v677_v55 = vpop.permute.xlu1 %676  ;;  %v659_v56 = vpop.permute.xlu0 %658  ;;  %v657_v61 = vadd.f32 %v656_v50, %v645_v51 }
 0x3bf   : > { %v665_v58 = vmul.f32 %v664_v47, %v659_v56  ;;  %v683_v63 = vmul.f32 %v682_v54, %v677_v55 }
 0x3c1   : > { %v667_v5 = vsel %vm666_vm11, %v665_v58, 0.0  ;;  %v685_v3 = vsel %vm684_vm12, %v683_v63, 0.0 }
 0x3c2   : > { %v668_v6 = vadd.f32 %v667_v5, %v657_v61  ;;  %v699_v11 = vpop.permute.xlu1 %698  ;;  %v688_v14 = vpop.permute.xlu0 %687 }
 0x3c3   : > { %v694_v16 = vmul.f32 %v693_v62, %v688_v14  ;;  %v705_v1 = vmul.f32 %v704_v8, %v699_v11 }
 0x3c4   : > { %v675_v17 = vadd.f32 %v674_v7, %v668_v6 }
 0x3c5   : > { %v696_v20 = vsel %vm695_vm13, %v694_v16, 0.0  ;;  %v707_v21 = vsel %vm706_vm14, %v705_v1, 0.0 }
 0x3c6   : > { %v686_v19 = vadd.f32 %v685_v3, %v675_v17 }
 0x3c8   : > { %v697_v0 = vadd.f32 %v696_v20, %v686_v19 }
 0x3ca   : > { %v708_v22 = vadd.f32 %v707_v21, %v697_v0 }
 0x3cc   : > { %v710_v23 = vrot.slane %v708_v22, 1 }
 0x3ce   : > { %v712_v25 = vadd.f32 %v710_v23, %v708_v22 }
 0x3d0   : > { %v715_v26 = vadd.f32 %v714_v24, %v712_v25 }
 0x3d2   : > { %v863_v27 = vmul.f32 -1.442695, %v715_v26 }
 0x3d4   : > { %974 = vpow2.f32 %v863_v27 }
 0x3de   : > { %v975_v28 = vpop.eup %974 }
 0x3df   : > { %v719_v2 = vadd.f32 1.0, %v975_v28 }
 0x3e1   : > { %976 = vrcp.f32 %v719_v2 }
 0x3eb   : > { %v977_v29 = vpop.eup %976 }
 0x3ec   : > { %v725_v30 = vrot.slane %v977_v29, %v579_v4 }
 0x3ee   : > { %v726_v31 = vmul.f32 %v725_v30, %v1354_v10  ;;  %v727_v32 = vmul.f32 %v725_v30, %v1351_v9  ;;  %v728_v33 = vmul.f32 %v725_v30, %v1357_v12  ;;  %v729_v34 = vmul.f32 %v725_v30, %v1363_v18 }
 0x3f0   : > { %730 = vst [vmem:[%s311_s20] sm:$0xff] %v726_v31  ;;  %731 = vst [vmem:[%s311_s20 + $0x8] sm:$0xff] %v727_v32 }
 0x3f1   : > { %732 = vst [vmem:[%s311_s20 + $0x10] sm:$0xff] %v728_v33  ;;  %733 = vst [vmem:[%s311_s20 + $0x18] sm:$0xff] %v729_v34 }
 0x3f2   : > { %1036 = shalt.err (!%p1033_p11)
}
 0x3f3   : > { %s1037_s21 = scalar_lea.hbm %s1428_s13, 512  ;;  %s1041_s17 = scalar_lea.hbm %s1485_s7, 1024 }
 0x3f4   : > { %p1038_p0 = scmp.ne.s32.totalorder %s1428_s13, %s1037_s21  ;;  %p1042_p5 = scmp.lt.u32.totalorder %s1428_s13, %s1485_s7 }
 0x3f5   : > { %p1043_p12 = scmp.lt.u32.totalorder %s1041_s17, %s1037_s21  ;;  %p1045_p13 = scmp.lt.u32.totalorder %s1037_s21, %s1428_s13 }
 0x3f6   : > { %p1039_p2 = pnand %p1038_p0, %p1501_p3 }
 0x3f7   : > { %p1044_p6 = por %p1043_p12, %p1042_p5 }
 0x3f8   : > { %p1040_p7 = pneg %p1039_p2 }
 0x3f9   : > { %p1046_p8 = por %p1045_p13, %p1044_p6 }
 0x3fb   : > { %p1047_p9 = pnand %p1046_p8, %p1040_p7 }
 0x3fd   : > { %1050 = shalt.err (!%p1047_p9)
}
 0x3fe   : > { %s1109_s9 = smov 128   ;;  %s1110_s22 = smov 8  }
 0x3ff   : > { %906 = dma.vmem_to_hbm [thread:$0]  (%p1501_p3), %s1430_s23, 512, %s1428_s13, %s735_s1, %s1109_s9, %s1109_s9, %s1110_s22  }
 0x400 PF: > { %s763_s16 = sand.u32 1, %s1081_s26   ;;  %p1502_p10 = scmp.ne.s32.totalorder %s1493_s15, 0 }
 0x401   : > { %p1503_p1 = scmp.ge.s32.totalorder %s1093_s29, 2  ;;  %s764_s10 = scalar_lea.sflag [#allocation5], %s763_s16 }
 0x403   : > { %p917_p4 = pnand %p1503_p1, %p1502_p10 }
 0x405   : > { %1076 = dma.done.wait (!%p917_p4), %s764_s10, 512  }
 0x406   : > { %1078 = vsyncadd (!%p917_p4), %s764_s10, 4294966784  ;;  %p22_p11 = scmp.ge.s32.totalorder %s1179_s8, 4   ;;  %s1504_s26 = smov %s1085_s27 }
 0x407   : > { %s1505_s27 = smov %s1089_s28  ;;  %s1506_s28 = smov %s1191_s11 }
 0x408   : > { %s1507_s29 = smov %s1179_s8  ;;  %24 = sbr.rel (!%p22_p11) target bundleno = 8 (0x8), region = 98 }
 0x40f   :  { %769 = vsyncpa [#allocation4], 1 }
 0x410   :  { %771 = vsyncpa [#allocation4 + $0x1], 1 }
 0x411   :  { %772 = vsyncpa [#allocation5], 1 }
 0x412   :  { %774 = vsyncpa [#allocation5 + $0x1], 1 }
 0x413   :  { %775 = vsyncpa [#allocation6], 1 }
 0x414   :  { %777 = vsyncpa [#allocation6 + $0x1], 1 }

</bundles_post_ra>
